<compile_context>
chip_gen: v5e
topology: v5e:2x2
jax: 0.10.0
libtpu: 0.0.40
codegen_flags: <defaults>
</compile_context>

<pallas_src>
import jax
import jax.numpy as jnp
from jax.experimental import pallas as pl
from jax.experimental.pallas import tpu as pltpu


def mps_kernel(params_ref, ut_ref, xt_ref, x_ref, eps_ref, epsy_ref,
               out_ref, acc_ref, mmax_ref):
    """One (S-block, N-tile) step of the folded forward pass.

    params_ref : [M+2]            SMEM: [sigma*V (M), b@V + c, sigma_y]
    ut_ref     : [1, d]           (W @ V)^T
    xt_ref     : [d, tile_N]      X^T tile (same candidates as x_ref)
    x_ref      : [tile_N, d]      candidate tile (for the gather)
    eps_ref    : [M, S_blk, tile_N]  x-model noise, lane-dense in N
    epsy_ref   : [S_blk, tile_N]     y-model noise, lane-dense in N
    out_ref    : [S_blk, d]       gathered argmax candidates (resident over N)
    acc_ref    : [S_blk, d] f32   running best rows (VMEM scratch)
    mmax_ref   : [S_blk, 1] f32   running max score   (VMEM scratch)
    """
    ni = pl.program_id(1)
    n_last = pl.num_programs(1) - 1
    tile_n = x_ref.shape[0]
    n_models = eps_ref.shape[0]

    # base[n] = X[n, :] @ (W @ V)  -- one skinny MXU pass, lane-dense output.
    base = jnp.dot(ut_ref[...], xt_ref[...],
                   preferred_element_type=jnp.float32)        # [1, tile_N]

    c_total = params_ref[n_models]       # b @ V + c
    sig_y = params_ref[n_models + 1]

    # noise[s, n] = sum_m (sigma[m] * V[m]) * eps[m, s, n]  (VPU, fully dense).
    noise = sig_y * epsy_ref[...]                              # [S_blk, tile_N]
    for m in range(n_models):            # M is small & static -> unrolled
        noise = noise + params_ref[m] * eps_ref[m]

    scores = base + c_total + noise                            # [S_blk, tile_N]

    # Per-sample max over this tile + first-occurrence index (lane axis).
    tile_max = jnp.max(scores, axis=-1, keepdims=True)         # [S_blk, 1]
    lane_iota = jax.lax.broadcasted_iota(jnp.int32, scores.shape, 1)
    hit = scores == tile_max
    local_idx = jnp.min(jnp.where(hit, lane_iota, tile_n),
                        axis=-1, keepdims=True)                # [S_blk, 1]

    # One-hot MXU gather of the winning rows (no scalar extraction, no OOB).
    onehot = (lane_iota == local_idx).astype(x_ref.dtype)      # [S_blk, tile_N]
    local_rows = jnp.dot(onehot, x_ref[...],
                         preferred_element_type=jnp.float32)   # [S_blk, d]

    @pl.when(ni == 0)
    def _init():
        mmax_ref[...] = tile_max
        acc_ref[...] = local_rows

    @pl.when(ni > 0)
    def _update():
        # Strict '>' keeps the first occurrence across tiles (argmax semantics).
        take = tile_max > mmax_ref[...]                        # [S_blk, 1]
        mmax_ref[...] = jnp.where(take, tile_max, mmax_ref[...])
        acc_ref[...] = jnp.where(take, local_rows, acc_ref[...])

    @pl.when(ni == n_last)
    def _finalize():
        out_ref[...] = acc_ref[...].astype(out_ref.dtype)


def max_posterior_sampling_joco(X, W, b, sigma, eps, V, yparams, eps_y,
                                *, block_n=256):
    """Forward pass (replacement=True, propagate_uncertainty_{x,y}=True).

    X      : [N, d]       candidates
    W      : [d, M]       stacked x-model weights
    b      : [1, M]       x-model biases
    sigma  : [1, M]       x-model posterior stddevs
    eps    : [M, S, N]    x-model noise (lane-dense layout)
    V      : [M, 1]       y-model weights
    yparams: [2]          (c, sigma_y)
    eps_y  : [S, N]       y-model noise
    returns: [S, d]       gathered argmax candidates
    """
    N, d = X.shape
    M = W.shape[1]
    S = eps.shape[1]
    assert eps.shape == (M, S, N), eps.shape
    assert eps_y.shape == (S, N), eps_y.shape

    block_n = min(block_n, N)
    assert N % block_n == 0, "N must be a multiple of block_n"
    # S-blocks of 8 rows (vreg sublane count) when possible -> megacore-friendly
    # parallel axis; otherwise a single full-S block (full-dim blocks are legal).
    s_blk = 8 if (S % 8 == 0) else S
    num_s_blocks = S // s_blk
    num_n_tiles = N // block_n

    # Tiny host-side precomputes (folded constants only; the O(N) work stays in
    # the kernel).
    ut = (W @ V).reshape(1, d).astype(jnp.float32)             # (W@V)^T
    xt = X.T                                                   # [d, N]
    sv = (sigma.reshape(M) * V.reshape(M)).astype(jnp.float32)
    c_total = jnp.dot(b.reshape(M), V.reshape(M)) + yparams[0]
    params = jnp.concatenate(
        [sv, jnp.stack([c_total, yparams[1]])]).astype(jnp.float32)  # [M+2]

    return pl.pallas_call(
        mps_kernel,
        out_shape=jax.ShapeDtypeStruct((S, d), X.dtype),
        grid=(num_s_blocks, num_n_tiles),
        in_specs=[
            pl.BlockSpec(memory_space=pltpu.MemorySpace.SMEM),           # params
            pl.BlockSpec((1, d), lambda si, ni: (0, 0)),                 # ut
            pl.BlockSpec((d, block_n), lambda si, ni: (0, ni)),          # xt
            pl.BlockSpec((block_n, d), lambda si, ni: (ni, 0)),          # X
            pl.BlockSpec((M, s_blk, block_n), lambda si, ni: (0, si, ni)),  # eps
            pl.BlockSpec((s_blk, block_n), lambda si, ni: (si, ni)),     # eps_y
        ],
        out_specs=pl.BlockSpec((s_blk, d), lambda si, ni: (si, 0)),
        scratch_shapes=[
            pltpu.VMEM((s_blk, d), jnp.float32),   # running best rows
            pltpu.VMEM((s_blk, 1), jnp.float32),   # running max score
        ],
        compiler_params=pltpu.CompilerParams(
            dimension_semantics=("parallel", "arbitrary"),
            vmem_limit_bytes=32 * 1024 * 1024,
        ),
    )(params, ut, xt, X, eps, eps_y)


if __name__ == "__main__":
    # Small but non-trivial shapes: multiple N tiles and multiple S blocks.
    N, d = 1024, 32          # candidates x feature dim
    M = 4                    # number of x-models (models_list[1:])
    S = 16                   # num_samples
    block_n = 256

    key = jax.random.PRNGKey(0)
    ks = jax.random.split(key, 8)

    X = jax.random.uniform(ks[0], (N, d), dtype=jnp.float32)
    W = jax.random.normal(ks[1], (d, M), dtype=jnp.float32) * 0.5
    b = jax.random.normal(ks[2], (1, M), dtype=jnp.float32) * 0.1
    sigma = jnp.abs(jax.random.normal(ks[3], (1, M), dtype=jnp.float32)) * 0.2
    eps = jax.random.normal(ks[4], (M, S, N), dtype=jnp.float32)
    V = jax.random.normal(ks[5], (M, 1), dtype=jnp.float32)
    yparams = jnp.array([0.05, 0.1], dtype=jnp.float32)   # (c, sigma_y)
    eps_y = jax.random.normal(ks[6], (S, N), dtype=jnp.float32)

    out = max_posterior_sampling_joco(X, W, b, sigma, eps, V, yparams, eps_y,
                                      block_n=block_n)
    out = jax.block_until_ready(out)
    assert out.shape == (S, d)

    # Pure-JAX reference in the ORIGINAL (unfolded) op order, mirroring the
    # PyTorch forward semantics.
    mean = X @ W                                       # [N, M]
    eps_snm = jnp.transpose(eps, (1, 2, 0))            # [S, N, M]
    all_y = mean[None] + b + sigma * eps_snm           # [S, N, M]
    scores = (all_y @ V)[..., 0] + yparams[0] + yparams[1] * eps_y   # [S, N]
    ref_idx = jnp.argmax(scores, axis=-1)              # [S]

    # 1) Every output row must be a (near-exact) copy of some candidate row.
    d2 = jnp.sum((out[:, None, :] - X[None, :, :]) ** 2, axis=-1)    # [S, N]
    ker_idx = jnp.argmin(d2, axis=-1)
    row_err = float(jnp.max(jnp.sqrt(d2[jnp.arange(S), ker_idx])))
    assert row_err < 1e-5, f"output rows are not rows of X (err={row_err})"

    # 2) The selected candidate must maximize the posterior-sample objective.
    #    (FP re-association in the folded kernel may flip exact near-ties, so
    #    compare achieved score against the reference max, not indices.)
    best = scores[jnp.arange(S), ref_idx]
    got = scores[jnp.arange(S), ker_idx]
    gap = float(jnp.max(best - got))
    assert gap < 1e-3, f"selected candidate is not the argmax (gap={gap})"

    print("KERNEL_OK")
</pallas_src>

<mosaic_0001>
module attributes {stable_mosaic.version = 11 : i64} {
  func.func @mps_kernel(%arg0: i32, %arg1: i32, %arg2: memref<6xf32, #tpu.memory_space<smem>>, %arg3: memref<1x32xf32, #tpu.memory_space<vmem>>, %arg4: memref<32x256xf32, #tpu.memory_space<vmem>>, %arg5: memref<256x32xf32, #tpu.memory_space<vmem>>, %arg6: memref<4x8x256xf32, #tpu.memory_space<vmem>>, %arg7: memref<8x256xf32, #tpu.memory_space<vmem>>, %arg8: memref<8x32xf32, #tpu.memory_space<vmem>>, %arg9: memref<8x32xf32, #tpu.memory_space<vmem>>, %arg10: memref<8x1xf32, #tpu.memory_space<vmem>>) attributes {dimension_semantics = [#tpu.dimension_semantics<parallel>, #tpu.dimension_semantics<arbitrary>], iteration_bounds = array<i64: 2, 4>, scalar_prefetch = 0 : i64, scratch_operands = 2 : i64, tpu.core_type = #tpu.core_type<tc>, window_params = [{transform_indices = @transform_0, window_bounds = array<i64: 6>}, {pipeline_mode = #tpu.pipeline_mode<synchronous>, transform_indices = @transform_1, window_bounds = array<i64: 1, 32>}, {transform_indices = @transform_2, window_bounds = array<i64: 32, 256>}, {transform_indices = @transform_3, window_bounds = array<i64: 256, 32>}, {transform_indices = @transform_4, window_bounds = array<i64: 4, 8, 256>}, {transform_indices = @transform_5, window_bounds = array<i64: 8, 256>}, {transform_indices = @transform_6, window_bounds = array<i64: 8, 32>}]} {
    %c0 = arith.constant 0 : index
    %c0_0 = arith.constant 0 : index
    %0 = vector.load %arg3[%c0, %c0_0] : memref<1x32xf32, #tpu.memory_space<vmem>>, vector<1x32xf32>
    %c0_1 = arith.constant 0 : index
    %c0_2 = arith.constant 0 : index
    %1 = vector.load %arg4[%c0_1, %c0_2] : memref<32x256xf32, #tpu.memory_space<vmem>>, vector<32x256xf32>
    %cst = arith.constant dense<0.000000e+00> : vector<1x256xf32>
    %2 = tpu.matmul %0, %1, %cst {dimension_numbers = #tpu.dot_dimension_numbers<[1], [0], [0], [1], [0, 0, 1, 1], [], []>} : vector<1x32xf32>, vector<32x256xf32>, vector<1x256xf32> -> vector<1x256xf32>
    %c4 = arith.constant 4 : index
    %3 = memref.load %arg2[%c4] : memref<6xf32, #tpu.memory_space<smem>>
    %c5 = arith.constant 5 : index
    %4 = memref.load %arg2[%c5] : memref<6xf32, #tpu.memory_space<smem>>
    %c0_3 = arith.constant 0 : index
    %c0_4 = arith.constant 0 : index
    %5 = vector.load %arg7[%c0_3, %c0_4] : memref<8x256xf32, #tpu.memory_space<vmem>>, vector<8x256xf32>
    %6 = vector.broadcast %4 : f32 to vector<8x256xf32>
    %7 = arith.mulf %6, %5 : vector<8x256xf32>
    %c0_5 = arith.constant 0 : index
    %8 = memref.load %arg2[%c0_5] : memref<6xf32, #tpu.memory_space<smem>>
    %c0_6 = arith.constant 0 : index
    %c0_7 = arith.constant 0 : index
    %c0_8 = arith.constant 0 : index
    %9 = vector.load %arg6[%c0_6, %c0_7, %c0_8] : memref<4x8x256xf32, #tpu.memory_space<vmem>>, vector<1x8x256xf32>
    %10 = vector.shape_cast %9 : vector<1x8x256xf32> to vector<8x256xf32>
    %11 = vector.broadcast %8 : f32 to vector<8x256xf32>
    %12 = arith.mulf %11, %10 : vector<8x256xf32>
    %13 = arith.addf %7, %12 : vector<8x256xf32>
    %c1 = arith.constant 1 : index
    %14 = memref.load %arg2[%c1] : memref<6xf32, #tpu.memory_space<smem>>
    %c1_9 = arith.constant 1 : index
    %c0_10 = arith.constant 0 : index
    %c0_11 = arith.constant 0 : index
    %15 = vector.load %arg6[%c1_9, %c0_10, %c0_11] : memref<4x8x256xf32, #tpu.memory_space<vmem>>, vector<1x8x256xf32>
    %16 = vector.shape_cast %15 : vector<1x8x256xf32> to vector<8x256xf32>
    %17 = vector.broadcast %14 : f32 to vector<8x256xf32>
    %18 = arith.mulf %17, %16 : vector<8x256xf32>
    %19 = arith.addf %13, %18 : vector<8x256xf32>
    %c2 = arith.constant 2 : index
    %20 = memref.load %arg2[%c2] : memref<6xf32, #tpu.memory_space<smem>>
    %c2_12 = arith.constant 2 : index
    %c0_13 = arith.constant 0 : index
    %c0_14 = arith.constant 0 : index
    %21 = vector.load %arg6[%c2_12, %c0_13, %c0_14] : memref<4x8x256xf32, #tpu.memory_space<vmem>>, vector<1x8x256xf32>
    %22 = vector.shape_cast %21 : vector<1x8x256xf32> to vector<8x256xf32>
    %23 = vector.broadcast %20 : f32 to vector<8x256xf32>
    %24 = arith.mulf %23, %22 : vector<8x256xf32>
    %25 = arith.addf %19, %24 : vector<8x256xf32>
    %c3 = arith.constant 3 : index
    %26 = memref.load %arg2[%c3] : memref<6xf32, #tpu.memory_space<smem>>
    %c3_15 = arith.constant 3 : index
    %c0_16 = arith.constant 0 : index
    %c0_17 = arith.constant 0 : index
    %27 = vector.load %arg6[%c3_15, %c0_16, %c0_17] : memref<4x8x256xf32, #tpu.memory_space<vmem>>, vector<1x8x256xf32>
    %28 = vector.shape_cast %27 : vector<1x8x256xf32> to vector<8x256xf32>
    %29 = vector.broadcast %26 : f32 to vector<8x256xf32>
    %30 = arith.mulf %29, %28 : vector<8x256xf32>
    %31 = arith.addf %25, %30 : vector<8x256xf32>
    %32 = vector.broadcast %3 : f32 to vector<1x256xf32>
    %33 = arith.addf %2, %32 : vector<1x256xf32>
    %34 = vector.broadcast %33 : vector<1x256xf32> to vector<8x256xf32>
    %35 = arith.addf %34, %31 : vector<8x256xf32>
    %cst_18 = arith.constant dense<0xFF800000> : vector<8xf32>
    %36 = vector.multi_reduction <maximumf>, %35, %cst_18 [1] : vector<8x256xf32> to vector<8xf32>
    %37 = vector.shape_cast %36 : vector<8xf32> to vector<8x1xf32>
    %38 = tpu.iota {dimensions = array<i32: 1>} : vector<8x256xi32>
    %39 = vector.broadcast %37 : vector<8x1xf32> to vector<8x256xf32>
    %40 = arith.cmpf oeq, %35, %39 : vector<8x256xf32>
    %c256_i32 = arith.constant 256 : i32
    %41 = vector.broadcast %c256_i32 : i32 to vector<8x256xi32>
    %42 = arith.select %40, %38, %41 : vector<8x256xi1>, vector<8x256xi32>
    %cst_19 = arith.constant dense<2147483647> : vector<8xi32>
    %43 = vector.multi_reduction <minsi>, %42, %cst_19 [1] : vector<8x256xi32> to vector<8xi32>
    %44 = vector.shape_cast %43 : vector<8xi32> to vector<8x1xi32>
    %45 = vector.broadcast %44 : vector<8x1xi32> to vector<8x256xi32>
    %46 = arith.cmpi eq, %38, %45 : vector<8x256xi32>
    %47 = arith.extui %46 : vector<8x256xi1> to vector<8x256xi32>
    %48 = arith.sitofp %47 : vector<8x256xi32> to vector<8x256xf32>
    %c0_20 = arith.constant 0 : index
    %c0_21 = arith.constant 0 : index
    %49 = vector.load %arg5[%c0_20, %c0_21] : memref<256x32xf32, #tpu.memory_space<vmem>>, vector<256x32xf32>
    %cst_22 = arith.constant dense<0.000000e+00> : vector<8x32xf32>
    %50 = tpu.matmul %48, %49, %cst_22 {dimension_numbers = #tpu.dot_dimension_numbers<[1], [0], [0], [1], [0, 0, 1, 1], [], []>} : vector<8x256xf32>, vector<256x32xf32>, vector<8x32xf32> -> vector<8x32xf32>
    %c0_i32 = arith.constant 0 : i32
    %51 = arith.cmpi eq, %arg1, %c0_i32 : i32
    %52 = arith.extui %51 : i1 to i32
    %c0_i32_23 = arith.constant 0 : i32
    %53 = arith.cmpi ne, %52, %c0_i32_23 : i32
    scf.if %53 {
      %c0_27 = arith.constant 0 : index
      %c0_28 = arith.constant 0 : index
      %60 = vector.load %arg10[%c0_27, %c0_28] : memref<8x1xf32, #tpu.memory_space<vmem>>, vector<8x1xf32>
      tpu.vector_store %arg10[%c0_27, %c0_28], %37 {strides = array<i32>} : memref<8x1xf32, #tpu.memory_space<vmem>>, vector<8x1xf32>,
      %c0_29 = arith.constant 0 : index
      %c0_30 = arith.constant 0 : index
      %61 = vector.load %arg9[%c0_29, %c0_30] : memref<8x32xf32, #tpu.memory_space<vmem>>, vector<8x32xf32>
      tpu.vector_store %arg9[%c0_29, %c0_30], %50 {strides = array<i32>} : memref<8x32xf32, #tpu.memory_space<vmem>>, vector<8x32xf32>,
    } else {
    }
    %c0_i32_24 = arith.constant 0 : i32
    %54 = arith.cmpi sgt, %arg1, %c0_i32_24 : i32
    %55 = arith.extui %54 : i1 to i32
    %c0_i32_25 = arith.constant 0 : i32
    %56 = arith.cmpi ne, %55, %c0_i32_25 : i32
    scf.if %56 {
      %c0_27 = arith.constant 0 : index
      %c0_28 = arith.constant 0 : index
      %60 = vector.load %arg10[%c0_27, %c0_28] : memref<8x1xf32, #tpu.memory_space<vmem>>, vector<8x1xf32>
      %61 = arith.cmpf ogt, %37, %60 : vector<8x1xf32>
      %c0_29 = arith.constant 0 : index
      %c0_30 = arith.constant 0 : index
      %62 = vector.load %arg10[%c0_29, %c0_30] : memref<8x1xf32, #tpu.memory_space<vmem>>, vector<8x1xf32>
      %63 = arith.select %61, %37, %62 : vector<8x1xi1>, vector<8x1xf32>
      %c0_31 = arith.constant 0 : index
      %c0_32 = arith.constant 0 : index
      %64 = vector.load %arg10[%c0_31, %c0_32] : memref<8x1xf32, #tpu.memory_space<vmem>>, vector<8x1xf32>
      tpu.vector_store %arg10[%c0_31, %c0_32], %63 {strides = array<i32>} : memref<8x1xf32, #tpu.memory_space<vmem>>, vector<8x1xf32>,
      %c0_33 = arith.constant 0 : index
      %c0_34 = arith.constant 0 : index
      %65 = vector.load %arg9[%c0_33, %c0_34] : memref<8x32xf32, #tpu.memory_space<vmem>>, vector<8x32xf32>
      %66 = vector.shape_cast %61 : vector<8x1xi1> to vector<8x1xi1>
      %67 = vector.broadcast %66 : vector<8x1xi1> to vector<8x32xi1>
      %68 = arith.select %67, %50, %65 : vector<8x32xi1>, vector<8x32xf32>
      %c0_35 = arith.constant 0 : index
      %c0_36 = arith.constant 0 : index
      %69 = vector.load %arg9[%c0_35, %c0_36] : memref<8x32xf32, #tpu.memory_space<vmem>>, vector<8x32xf32>
      tpu.vector_store %arg9[%c0_35, %c0_36], %68 {strides = array<i32>} : memref<8x32xf32, #tpu.memory_space<vmem>>, vector<8x32xf32>,
    } else {
    }
    %c3_i32 = arith.constant 3 : i32
    %57 = arith.cmpi eq, %arg1, %c3_i32 : i32
    %58 = arith.extui %57 : i1 to i32
    %c0_i32_26 = arith.constant 0 : i32
    %59 = arith.cmpi ne, %58, %c0_i32_26 : i32
    scf.if %59 {
      %c0_27 = arith.constant 0 : index
      %c0_28 = arith.constant 0 : index
      %60 = vector.load %arg9[%c0_27, %c0_28] : memref<8x32xf32, #tpu.memory_space<vmem>>, vector<8x32xf32>
      %c0_29 = arith.constant 0 : index
      %c0_30 = arith.constant 0 : index
      %61 = vector.load %arg8[%c0_29, %c0_30] : memref<8x32xf32, #tpu.memory_space<vmem>>, vector<8x32xf32>
      tpu.vector_store %arg8[%c0_29, %c0_30], %60 {strides = array<i32>} : memref<8x32xf32, #tpu.memory_space<vmem>>, vector<8x32xf32>,
    } else {
    }
    return
  }
  func.func @transform_0(%arg0: i32, %arg1: i32) -> i32 {
    %c0_i32 = arith.constant 0 : i32
    %c0_i32_0 = arith.constant 0 : i32
    return %c0_i32 : i32
  }
  func.func @transform_1(%arg0: i32, %arg1: i32) -> (i32, i32) {
    %c0_i32 = arith.constant 0 : i32
    %c0_i32_0 = arith.constant 0 : i32
    %c0_i32_1 = arith.constant 0 : i32
    return %c0_i32, %c0_i32_0 : i32, i32
  }
  func.func @transform_2(%arg0: i32, %arg1: i32) -> (i32, i32) {
    %c0_i32 = arith.constant 0 : i32
    %c0_i32_0 = arith.constant 0 : i32
    return %c0_i32, %arg1 : i32, i32
  }
  func.func @transform_3(%arg0: i32, %arg1: i32) -> (i32, i32) {
    %c0_i32 = arith.constant 0 : i32
    %c0_i32_0 = arith.constant 0 : i32
    return %arg1, %c0_i32 : i32, i32
  }
  func.func @transform_4(%arg0: i32, %arg1: i32) -> (i32, i32, i32) {
    %c0_i32 = arith.constant 0 : i32
    %c0_i32_0 = arith.constant 0 : i32
    return %c0_i32, %arg0, %arg1 : i32, i32, i32
  }
  func.func @transform_5(%arg0: i32, %arg1: i32) -> (i32, i32) {
    %c0_i32 = arith.constant 0 : i32
    return %arg0, %arg1 : i32, i32
  }
  func.func @transform_6(%arg0: i32, %arg1: i32) -> (i32, i32) {
    %c0_i32 = arith.constant 0 : i32
    %c0_i32_0 = arith.constant 0 : i32
    return %arg0, %c0_i32 : i32, i32
  }
}

</mosaic_0001>

<bundles_post_ra>
// kernel: tpu_custom_call.1
= control target key start
LH: loop header
LB: loop body
LE: loop exit
PB: predicated region body
PF: predicated region fallthrough
CT: control target
= control target key end

     0   :  { %s1476_s0 = inlined_call_operand.vmem [shape: f32[6], index: 0, kind: input, shape index: {}]   ;;  %s1477_s1 = inlined_call_operand.vmem [shape: f32[1,32], index: 1, kind: input, shape index: {}]   ;;  %s1478_s2 = inlined_call_operand.vmem [shape: f32[32,1024], index: 2, kind: input, shape index: {}]   ;;  %s1479_s3 = inlined_call_operand.vmem [shape: f32[1024,32], index: 3, kind: input, shape index: {}]   ;;  %s1480_s4 = inlined_call_operand.vmem [shape: f32[4,16,1024], index: 4, kind: input, shape index: {}]   ;;  %s1481_s5 = inlined_call_operand.vmem [shape: f32[16,1024], index: 5, kind: input, shape index: {}]   ;;  %s1482_s6 = inlined_call_operand.hbm [shape: f32[16,32], index: 6, kind: output, shape index: {}]  }
   0x1   :  { %1486 = sst [smem:[#allocation17_spill]] %s1476_s0 }
   0x2   :  { %1487 = sst [smem:[#allocation18_spill]] %s1479_s3 }
   0x3   :  { %1488 = sst [smem:[#allocation19_spill]] %s1482_s6 }
   0x4   :  { %11 = vsyncpa [#allocation6], 0 }
   0x5   :  { %12 = vsyncpa [#allocation5], 0 }
   0x6   :  { %14 = vsyncpa [#allocation5 + $0x1], 0  ;;  %s1166_s21 = smov 0   ;;  %s1168_s22 = smov 0  }
   0x7   :  { %s1170_s23 = smov 0   ;;  %s1172_s24 = smov 0  }
   0x8   :  { %s1174_s25 = smov 0   ;;  %s1176_s26 = smov 0  }
   0x9   :  { %s1178_s27 = smov 0   ;;  %s1180_s28 = smov 0  }
   0xa   :  { %s1182_s29 = smov 0   ;;  %s1184_s30 = smov 0  }
   0xb   :  { %s1186_s7 = smov 0   ;;  %s1188_s8 = smov 0  }
   0xc LB: > { %s818_s10 = sadd.s32 4294967294, %s1126_s8   ;;  %s29_s11 = sadd.s32 1, %s1118_s30  ;;  %s1126_s8 = sphi %s1188_s8, %s20_s8   ;;  %s1122_s7 = sphi %s1186_s7, %s1521_s7   ;;  %s1118_s30 = sphi %s1184_s30, %s1520_s30   ;;  %s1114_s29 = sphi %s1182_s29, %s1519_s29   ;;  %s1110_s28 = sphi %s1180_s28, %s1518_s28   ;;  %s1106_s27 = sphi %s1178_s27, %s1517_s27   ;;  %s1102_s26 = sphi %s1176_s26, %s1516_s26   ;;  %s1098_s25 = sphi %s1174_s25, %s1515_s25   ;;  %s1094_s24 = sphi %s1172_s24, %s1514_s24   ;;  %s1090_s23 = sphi %s1170_s23, %s1513_s23   ;;  %s1086_s22 = sphi %s1168_s22, %s1512_s22   ;;  %s1082_s21 = sphi %s1166_s21, %s1511_s21  }
   0xd   : > { %s32_s12 = sadd.s32 1, %s1122_s7  ;;  %p30_p0 = scmp.ge.s32.totalorder %s29_s11, 4 }
   0xe   : > { %s81_s13 = sadd.s32 1, %s1106_s27  ;;  %p88_p1 = scmp.ne.s32.totalorder %s1106_s27, %s1102_s26 }
   0xf   : > { %p89_p2 = scmp.eq.s32.totalorder %s1126_s8, 0  ;;  %s1523_s11 = smov (%p30_p0, %s29_s11), 0 }
  0x10   : > { %1489 = sst [smem:[#allocation12_spill]] %s1523_s11  ;;  %s1525_s12 = smov (!%p30_p0, %s32_s12), %s1122_s7 }
  0x11   : > { %s78_s14 = ssub.s32 %s1118_s30, %s1523_s11  ;;  %p1239_p3 = por %p89_p2, %p88_p1 }
  0x12   : > { %p34_p4 = scmp.ge.s32.totalorder %s1525_s12, 2  ;;  %p79_p5 = scmp.eq.s32.totalorder %s78_s14, 0 }
  0x13   : > { %s135_s16 = sadd.s32 1, %s1098_s25  ;;  %p142_p6 = scmp.ne.s32.totalorder %s1098_s25, %s1094_s24 }
  0x14   : > { %s1527_s12 = smov (%p34_p4, %s1525_s12), 0  ;;  %s189_s9 = sadd.s32 1, %s1090_s23 }
  0x15   : > { %1491 = sst [smem:[#allocation13_spill]] %s1527_s12  ;;  %s130_s18 = ssub.s32 %s1122_s7, %s1527_s12 }
  0x16   : > { %s1249_s17 = scalar_select %p79_p5, %s1106_s27, %s81_s13  }
  0x17   : > { %p1253_p7 = por %p142_p6, %p89_p2  ;;  %s132_s20 = sor.u32 %s130_s18, %s78_s14 }
  0x18   : > { %1492 = sst [smem:[#allocation14_spill]] %s1249_s17  ;;  %p187_p8 = scmp.eq.s32.totalorder %s130_s18, 0 }
  0x19   : > { %p133_p9 = scmp.eq.s32.totalorder %s132_s20, 0  ;;  %p199_p10 = scmp.ne.s32.totalorder %s1090_s23, %s1086_s22 }
  0x1a   : > { %s1259_s11 = scalar_select %p187_p8, %s1090_s23, %s189_s9  }
  0x1b   : > { %s1262_s6 = scalar_select %p133_p9, %s1098_s25, %s135_s16  }
  0x1c   : > { %1494 = sst [smem:[#allocation15_spill]] %s1259_s11  ;;  %s1496_s3 = sadd.s32 4294967295, %s1126_s8  }
  0x1d   : > { %1495 = sst [smem:[#allocation16_spill]] %s1262_s6  ;;  %p200_p11 = scmp.eq.s32.totalorder %s1496_s3, 7 }
  0x1e   : > { %p205_p12 = scmp.ne.s32.totalorder %s1086_s22, %s1082_s21  ;;  %p206_p13 = scmp.eq.s32.totalorder %s818_s10, 7 }
  0x1f   : > { %p1270_p0 = por %p200_p11, %p199_p10  ;;  %p819_p1 = scmp.ge.s32.totalorder %s1126_s8, 1 }
  0x20   : > { %p1275_p2 = por %p206_p13, %p205_p12  ;;  %p213_p4 = scmp.lt.s32.totalorder %s1126_s8, 9 }
  0x21   : > { %s1499_s14 = smov %s1496_s3  ;;  %s1502_s0 = sld [smem:[#allocation17_spill]] }
  0x22   : > { %p1282_p5 = scmp.eq.s32.totalorder %s1499_s14, 0  ;;  %p1286_p6 = pnand %p819_p1, %p213_p4 }
  0x23   : > { %s1128_s20 = smov [#allocation4]   ;;  %p821_p10 = scmp.ge.s32.totalorder %s1126_s8, 8 }
  0x24   : > { %p870_p8 = pneg %p1286_p6 }
  0x25   : > { %235 = sbr.rel (%p821_p10) target bundleno = 69 (0x45), region = 24 }
  0x26   : > { %p871_p9 = pnand %p1282_p5, %p870_p8 }
  0x27   : > { %s225_s18 = sshll.u32 %s1502_s0, 4  ;;  %s226_s18 = int_to_ptr.vmem [resolvable:$true] %s225_s18 }
  0x28   : > { %873 = dma.vmem_to_smem (!%p871_p9), %s226_s18, 16, %s1128_s20, [#allocation6]  }
  0x2a   : > { %238 = sbr.rel (!%p1239_p3) target bundleno = 54 (0x36), region = 28  ;;  %s240_s14 = sand.u32 (%p1239_p3), 1, %s1106_s27  }
  0x2b   : > { %s863_s17 = sshll.u32 (%p1239_p3), %s1118_s30, 4  ;;  %s822_s10 = sshll.u32 (%p1239_p3), %s240_s14, 6 }
  0x2c   : > { %s245_s6 = scalar_lea.vmem (%p1239_p3), %s1478_s2, %s863_s17  ;;  %s242_s11 = scalar_lea.vmem (%p1239_p3), [#allocation7], %s822_s10 }
  0x2d   : > { %v258_v0 = vld [vmem:[%s245_s6] sm:$0xff] (%p1239_p3)  ;;  %v260_v1 = vld [vmem:[%s245_s6 + $0x8] sm:$0xff] (%p1239_p3) }
  0x2e   : > { %v262_v2 = vld [vmem:[%s245_s6 + $0x40] sm:$0xff] (%p1239_p3)  ;;  %259 = vst [vmem:[%s242_s11] sm:$0xff] (%p1239_p3), %v258_v0  ;;  %v264_v3 = vld [vmem:[%s245_s6 + $0x48] sm:$0xff] (%p1239_p3) }
  0x2f   : > { %261 = vst [vmem:[%s242_s11 + $0x8] sm:$0xff] %v260_v1  ;;  %v266_v4 = vld [vmem:[%s245_s6 + $0x80] sm:$0xff]  ;;  %v268_v5 = vld [vmem:[%s245_s6 + $0x88] sm:$0xff] }
  0x30   : > { %263 = vst [vmem:[%s242_s11 + $0x10] sm:$0xff] %v262_v2  ;;  %v270_v6 = vld [vmem:[%s245_s6 + $0xc0] sm:$0xff]  ;;  %v272_v7 = vld [vmem:[%s245_s6 + $0xc8] sm:$0xff] }
  0x31   : > { %265 = vst [vmem:[%s242_s11 + $0x18] sm:$0xff] %v264_v3 }
  0x32   : > { %267 = vst [vmem:[%s242_s11 + $0x20] sm:$0xff] %v266_v4 }
  0x33   : > { %269 = vst [vmem:[%s242_s11 + $0x28] sm:$0xff] %v268_v5 }
  0x34   : > { %271 = vst [vmem:[%s242_s11 + $0x30] sm:$0xff] %v270_v6 }
  0x35   : > { %273 = vst [vmem:[%s242_s11 + $0x38] sm:$0xff] %v272_v7 }
  0x36 PF: > { %288 = sbr.rel (!%p1253_p7) target bundleno = 69 (0x45), region = 55  ;;  %s290_s0 = sand.u32 (%p1253_p7), 1, %s1098_s25  }
  0x37   : > { %s826_s15 = sshll.u32 (%p1253_p7), %s1118_s30, 1  ;;  %s825_s17 = sshll.u32 (%p1253_p7), %s290_s0, 6 }
  0x38   : > { %s827_s18 = sshll.u32 (%p1253_p7), %s1122_s7, 3  ;;  %s292_s11 = scalar_lea.vmem (%p1253_p7), [#allocation8], %s825_s17 }
  0x39   : > { %s295_s20 = sadd.s32 (%p1253_p7), %s827_s18, %s826_s15 }
  0x3a   : > { %s828_s14 = sshll.u32 (%p1253_p7), %s295_s20, 3 }
  0x3b   : > { %s297_s6 = scalar_lea.vmem %s1480_s4, %s828_s14 }
  0x3c   : > { %v310_v8 = vld [vmem:[%s297_s6] sm:$0xff]  ;;  %v312_v9 = vld [vmem:[%s297_s6 + $0x8] sm:$0xff] }
  0x3d   : > { %v314_v10 = vld [vmem:[%s297_s6 + $0x80] sm:$0xff]  ;;  %311 = vst [vmem:[%s292_s11] sm:$0xff] %v310_v8  ;;  %v316_v11 = vld [vmem:[%s297_s6 + $0x88] sm:$0xff] }
  0x3e   : > { %313 = vst [vmem:[%s292_s11 + $0x8] sm:$0xff] %v312_v9  ;;  %v318_v12 = vld [vmem:[%s297_s6 + $0x100] sm:$0xff]  ;;  %v320_v13 = vld [vmem:[%s297_s6 + $0x108] sm:$0xff] }
  0x3f   : > { %315 = vst [vmem:[%s292_s11 + $0x10] sm:$0xff] %v314_v10  ;;  %v322_v14 = vld [vmem:[%s297_s6 + $0x180] sm:$0xff]  ;;  %v324_v15 = vld [vmem:[%s297_s6 + $0x188] sm:$0xff] }
  0x40   : > { %317 = vst [vmem:[%s292_s11 + $0x18] sm:$0xff] %v316_v11 }
  0x41   : > { %319 = vst [vmem:[%s292_s11 + $0x20] sm:$0xff] %v318_v12 }
  0x42   : > { %321 = vst [vmem:[%s292_s11 + $0x28] sm:$0xff] %v320_v13 }
  0x43   : > { %323 = vst [vmem:[%s292_s11 + $0x30] sm:$0xff] %v322_v14 }
  0x44   : > { %325 = vst [vmem:[%s292_s11 + $0x38] sm:$0xff] %v324_v15 }
  0x45 PF: > { %347 = sbr.rel (%p1286_p6) target bundleno = 877 (0x36d), region = 82 }
  0x4a   : > { %1073 = dma.done.wait (%p1282_p5), [#allocation6], 16  }
  0x4b   : > { %1075 = vsyncadd (%p1282_p5), [#allocation6], 4294967280  ;;  %s355_s19 = sand.u32 1, %s1102_s26   ;;  %s362_s0 = sand.u32 1, %s1094_s24  }
  0x4c   : > { %s831_s15 = sshll.u32 %s355_s19, 6  ;;  %s832_s17 = sshll.u32 %s362_s0, 6 }
  0x4d   : > { %s357_s18 = scalar_lea.vmem [#allocation7], %s831_s15  ;;  %s1321_s20 = scalar_lea.vmem [#allocation8], %s832_s17 }
  0x4e   : > { %368 = sfence }
  0x4f   : > { %s407_s3 = sand.u32 1, %s1086_s22   ;;  %v435_v16 = vld [vmem:[%s357_s18 + $0x30] sm:$0xff]  ;;  %v436_v17 = vld [vmem:[%s357_s18 + $0x38] sm:$0xff]  ;;  %v433_v18 = vld [vmem:[%s357_s18 + $0x20] sm:$0xff]  ;;  %vm480_vm0 = vcmask 261120   ;;  %s836_s9 = sshll.u32 %s1110_s28, 1  ;;  %v531_v4 = vlaneseq }
  0x50   : > { %s1326_s14 = sshll.u32 %s407_s3, 3  ;;  %496 = vmatpush.msra.mxu0 %v435_v16  ;;  %516 = vmatpush.msra.mxu1 %v436_v17  ;;  %v434_v19 = vld [vmem:[%s357_s18 + $0x28] sm:$0xff]  ;;  %v431_v20 = vld [vmem:[%s357_s18 + $0x10] sm:$0xff]  ;;  %v432_v21 = vld [vmem:[%s357_s18 + $0x18] sm:$0xff]  ;;  %p419_p3 = scmp.lt.s32.totalorder %s1114_s29, 1 }
  0x51   : > { %v429_v22 = vld [vmem:[%s357_s18] sm:$0xff]  ;;  %v430_v23 = vld [vmem:[%s357_s18 + $0x8] sm:$0xff]  ;;  %v428_v24 = vld [vmem:[%s1477_s1] sm:$0x1]  ;;  %p421_p7 = scmp.lt.s32.totalorder %s836_s9, 7  ;;  %s840_s11 = sld [smem:[#allocation4 + $0x5]] }
  0x52   : > { %497 = vmatpush.msra.mxu0 %v433_v18  ;;  %517 = vmatpush.msra.mxu1 %v434_v19  ;;  %s420_s10 = scalar_select %p419_p3, %s1114_s29, 1  ;;  %v445_v28 = vld [vmem:[%s1321_s20] sm:$0xff]  ;;  %v446_v29 = vld [vmem:[%s1321_s20 + $0x8] sm:$0xff]  ;;  %v842_v35 = vld [vmem:[%s1321_s20 + $0x10] sm:$0xff]  ;;  %v1347_v5 = vand.u32 127, %v531_v4 }
  0x53   : > { %s1529_s9 = smov (!%p421_p7, %s836_s9), 7  ;;  %s444_s19 = sld [smem:[#allocation4]]  ;;  %v843_v36 = vld [vmem:[%s1321_s20 + $0x18] sm:$0xff]  ;;  %v845_v42 = vld [vmem:[%s1321_s20 + $0x20] sm:$0xff]  ;;  %v846_v43 = vld [vmem:[%s1321_s20 + $0x28] sm:$0xff] }
  0x54   : > { %498 = vmatpush.msra.mxu0 %v431_v20  ;;  %518 = vmatpush.msra.mxu1 %v432_v21  ;;  %s837_s16 = sshll.u32 %s420_s10, 3  ;;  %s841_s24 = sld [smem:[#allocation4 + $0x1]]  ;;  %v848_v49 = vld [vmem:[%s1321_s20 + $0x30] sm:$0xff]  ;;  %v849_v50 = vld [vmem:[%s1321_s20 + $0x38] sm:$0xff]  ;;  %v1350_v6 = vadd.s32 128, %v1347_v5 }
  0x55   : > { %s424_s6 = sadd.s32 %s837_s16, %s1529_s9  ;;  %s844_s26 = sld [smem:[#allocation4 + $0x2]] }
  0x56   : > { %499 = vmatpush.msra.mxu0 %v429_v22  ;;  %519 = vmatpush.msra.mxu1 %v430_v23  ;;  %s838_s0 = sshll.u32 %s424_s6, 3  ;;  %s847_s9 = sld [smem:[#allocation4 + $0x3]] }
  0x57   : > { %850 = vmatmul.msk.f32.vlgmr.msra.gmra.mxu0 %vm480_vm0, %v428_v24  ;;  %851 = vmatmul.msk.f32.vlgmr.msra.gmra.mxu1 %vm480_vm0, %v428_v24  ;;  %s426_s18 = scalar_lea.vmem %s1481_s5, %s838_s0  ;;  %v441_v27 = vstv %s840_s11  ;;  %s839_s10 = sld [smem:[#allocation4 + $0x4]] }
  0x58   : > { %v439_v25 = vld [vmem:[%s426_s18] sm:$0xff]  ;;  %v440_v26 = vld [vmem:[%s426_s18 + $0x8] sm:$0xff]  ;;  %s834_s20 = sshll.u32 %s1110_s28, 5  ;;  %s409_s15 = scalar_lea.vmem [#allocation9], %s1326_s14 }
  0x59   : > { %v447_v30 = vstv %s444_s19  ;;  %v442_v31 = vmul.f32 %v441_v27, %v439_v25  ;;  %v443_v32 = vmul.f32 %v441_v27, %v440_v26  ;;  %p412_p11 = scmp.lt.s32.totalorder %s834_s20, 127  ;;  %s1503_s19 = sld [smem:[#allocation18_spill]] }
  0x5a   : > { %v448_v33 = vmul.f32 %v447_v30, %v445_v28  ;;  %v449_v34 = vmul.f32 %v447_v30, %v446_v29  ;;  %v456_v37 = vstv %s841_s24  ;;  %p856_p12 = scmp.ne.s32.totalorder %s1110_s28, 0 }
  0x5b   : > { %v457_v40 = vmul.f32 %v842_v35, %v456_v37  ;;  %v458_v41 = vmul.f32 %v843_v36, %v456_v37  ;;  %v465_v44 = vstv %s844_s26  ;;  %s1531_s20 = smov (!%p412_p11, %s834_s20), 127 }
  0x5c   : > { %v450_v38 = vadd.f32 %v448_v33, %v442_v31  ;;  %v451_v39 = vadd.f32 %v449_v34, %v443_v32  ;;  %v466_v47 = vmul.f32 %v845_v42, %v465_v44  ;;  %v467_v48 = vmul.f32 %v846_v43, %v465_v44  ;;  %s835_s16 = sshll.u32 %s1531_s20, 3 }
  0x5d   : > { %v474_v51 = vstv %s847_s9  ;;  %v479_v56 = vstv %s839_s10 }
  0x5e   : > { %v459_v45 = vadd.f32 %v457_v40, %v450_v38  ;;  %v460_v46 = vadd.f32 %v458_v41, %v451_v39  ;;  %v475_v54 = vmul.f32 %v848_v49, %v474_v51  ;;  %v476_v55 = vmul.f32 %v849_v50, %v474_v51 }
  0x5f   : > { %s1368_s0 = scalar_lea.vmem %s1503_s19, %s835_s16 }
  0x60   : > { %v468_v52 = vadd.f32 %v466_v47, %v459_v45  ;;  %v469_v53 = vadd.f32 %v467_v48, %v460_v46  ;;  %v575_v13 = vld [vmem:[%s1368_s0 + $0x78] sm:$0xff]  ;;  %v574_v15 = vld [vmem:[%s1368_s0 + $0x70] sm:$0xff]  ;;  %v573_v17 = vld [vmem:[%s1368_s0 + $0x68] sm:$0xff] }
  0x61   : > { %v591_v14 = vld [vmem:[%s1368_s0 + $0xf8] sm:$0xff]  ;;  %592 = vmatpush.msra.mxu2 %v575_v13  ;;  %v590_v16 = vld [vmem:[%s1368_s0 + $0xf0] sm:$0xff]  ;;  %v589_v18 = vld [vmem:[%s1368_s0 + $0xe8] sm:$0xff] }
  0x62   : > { %v477_v61 = vadd.f32 %v475_v54, %v468_v52  ;;  %v478_v62 = vadd.f32 %v476_v55, %v469_v53  ;;  %612 = vmatpush.msra.mxu3 %v591_v14  ;;  %v572_v19 = vld [vmem:[%s1368_s0 + $0x60] sm:$0xff]  ;;  %v571_v21 = vld [vmem:[%s1368_s0 + $0x58] sm:$0xff]  ;;  %v570_v23 = vld [vmem:[%s1368_s0 + $0x50] sm:$0xff]  ;;  %v1129_v54 = vmov 1.0  }
  0x63   : > { %593 = vmatpush.msra.mxu2 %v574_v15  ;;  %v588_v20 = vld [vmem:[%s1368_s0 + $0xe0] sm:$0xff]  ;;  %v587_v22 = vld [vmem:[%s1368_s0 + $0xd8] sm:$0xff]  ;;  %v586_v24 = vld [vmem:[%s1368_s0 + $0xd0] sm:$0xff] }
  0x64   : > { %613 = vmatpush.msra.mxu3 %v590_v16  ;;  %v569_v25 = vld [vmem:[%s1368_s0 + $0x48] sm:$0xff]  ;;  %v568_v27 = vld [vmem:[%s1368_s0 + $0x40] sm:$0xff]  ;;  %v567_v29 = vld [vmem:[%s1368_s0 + $0x38] sm:$0xff] }
  0x65   : > { %594 = vmatpush.msra.mxu2 %v573_v17  ;;  %v585_v26 = vld [vmem:[%s1368_s0 + $0xc8] sm:$0xff]  ;;  %v584_v28 = vld [vmem:[%s1368_s0 + $0xc0] sm:$0xff]  ;;  %v583_v30 = vld [vmem:[%s1368_s0 + $0xb8] sm:$0xff] }
  0x66   : > { %614 = vmatpush.msra.mxu3 %v589_v18  ;;  %v566_v31 = vld [vmem:[%s1368_s0 + $0x30] sm:$0xff]  ;;  %v565_v33 = vld [vmem:[%s1368_s0 + $0x28] sm:$0xff]  ;;  %v564_v35 = vld [vmem:[%s1368_s0 + $0x20] sm:$0xff] }
  0x67   : > { %595 = vmatpush.msra.mxu2 %v572_v19  ;;  %v582_v32 = vld [vmem:[%s1368_s0 + $0xb0] sm:$0xff]  ;;  %v581_v34 = vld [vmem:[%s1368_s0 + $0xa8] sm:$0xff]  ;;  %v580_v36 = vld [vmem:[%s1368_s0 + $0xa0] sm:$0xff] }
  0x68   : > { %615 = vmatpush.msra.mxu3 %v588_v20  ;;  %v563_v37 = vld [vmem:[%s1368_s0 + $0x18] sm:$0xff]  ;;  %v562_v43 = vld [vmem:[%s1368_s0 + $0x10] sm:$0xff]  ;;  %v561_v45 = vld [vmem:[%s1368_s0 + $0x8] sm:$0xff] }
  0x69   : > { %596 = vmatpush.msra.mxu2 %v571_v21  ;;  %v579_v38 = vld [vmem:[%s1368_s0 + $0x98] sm:$0xff]  ;;  %v578_v44 = vld [vmem:[%s1368_s0 + $0x90] sm:$0xff]  ;;  %v577_v46 = vld [vmem:[%s1368_s0 + $0x88] sm:$0xff] }
  0x6a   : > { %616 = vmatpush.msra.mxu3 %v587_v22  ;;  %v560_v47 = vld [vmem:[%s1368_s0] sm:$0xff] }
  0x6b   : > { %597 = vmatpush.msra.mxu2 %v570_v23  ;;  %v576_v48 = vld [vmem:[%s1368_s0 + $0x80] sm:$0xff] }
  0x6c   : > { %617 = vmatpush.msra.mxu3 %v586_v24 }
  0x6d   : > { %598 = vmatpush.msra.mxu2 %v569_v25 }
  0x6e   : > { %618 = vmatpush.msra.mxu3 %v585_v26 }
  0x6f   : > { %599 = vmatpush.msra.mxu2 %v568_v27 }
  0x70   : > { %619 = vmatpush.msra.mxu3 %v584_v28 }
  0x71   : > { %600 = vmatpush.msra.mxu2 %v567_v29 }
  0x72   : > { %620 = vmatpush.msra.mxu3 %v583_v30 }
  0x73   : > { %601 = vmatpush.msra.mxu2 %v566_v31 }
  0x74   : > { %621 = vmatpush.msra.mxu3 %v582_v32 }
  0x75   : > { %602 = vmatpush.msra.mxu2 %v565_v33 }
  0x76   : > { %622 = vmatpush.msra.mxu3 %v581_v34 }
  0x77   : > { %603 = vmatpush.msra.mxu2 %v564_v35 }
  0x78   : > { %623 = vmatpush.msra.mxu3 %v580_v36 }
  0x79   : > { %604 = vmatpush.msra.mxu2 %v563_v37 }
  0x7a   : > { %624 = vmatpush.msra.mxu3 %v579_v38 }
  0x7b   : > { %605 = vmatpush.msra.mxu2 %v562_v43 }
  0x7c   : > { %625 = vmatpush.msra.mxu3 %v578_v44 }
  0x7d   : > { %606 = vmatpush.msra.mxu2 %v561_v45 }
  0x7e   : > { %626 = vmatpush.msra.mxu3 %v577_v46 }
  0x7f   : > { %607 = vmatpush.msra.mxu2 %v560_v47 }
  0x80   : > { %627 = vmatpush.msra.mxu3 %v576_v48 }
  0xd4   : > { %v501_v57 = vpop.f32.mrf.mxu0  ;;  %v521_v58 = vpop.f32.mrf.mxu1 }
  0xd5   : > { %v502_v59 = vadd.f32 %v501_v57, %v479_v56  ;;  %v522_v60 = vadd.f32 %v521_v58, %v479_v56 }
  0xd7   : > { %v524_v63 = vperm.slane %v502_v59, 0  ;;  %v525_v0 = vperm.slane %v522_v60, 0 }
  0xd9   : > { %v526_v1 = vadd.f32 %v524_v63, %v477_v61  ;;  %v527_v2 = vadd.f32 %v525_v0, %v478_v62 }
  0xdb   : > { %v528_v3 = vmax.f32 %v526_v1, %v527_v2 }
  0xdd   : > { %529 = vmax.xlane.f32.xlu0 %v528_v3 }
 0x150   : > { %v1352_v7 = vpop.xlane.xlu0 %529 }
 0x151   : > { %vm534_vm1 = vcmp.eq.f32.partialorder %v526_v1, %v1352_v7  ;;  %vm535_vm2 = vcmp.eq.f32.partialorder %v527_v2, %v1352_v7 }
 0x152   : > { %v536_v8 = vsel %vm534_vm1, %v1347_v5, 256  ;;  %v537_v9 = vsel %vm535_vm2, %v1350_v6, 256 }
 0x153   : > { %vm538_vm3 = vcmp.lt.s32.totalorder %v536_v8, %v537_v9 }
 0x154   : > { %v1358_v10 = vsel %vm538_vm3, %v536_v8, %v537_v9 }
 0x155   : > { %v541_v11 = vshra.s32 %v1358_v10, 16  ;;  %v540_v39 = vand.u32 65535, %v1358_v10 }
 0x157   : > { %v1361_v12 = vcvt.s32.f32 %v541_v11  ;;  %v542_v41 = vcvt.s32.f32 %v540_v39 }
 0x159   : > { %544 = vmin.xlane.f32.xlu0 %v1361_v12 }
 0x1cc   : > { %v545_v40 = vpop.xlane.xlu0 %544 }
 0x1cd   : > { %vm546_vm4 = vcmp.eq.f32.partialorder %v1361_v12, %v545_v40  ;;  %v551_v49 = vcvt.f32.s32 %v545_v40 }
 0x1ce   : > { %v547_v42 = vsel %vm546_vm4, %v542_v41, inf }
 0x1cf   : > { %548 = vmin.xlane.f32.xlu1 %v547_v42  ;;  %v552_v51 = vshll.u32 %v551_v49, 16 }
 0x242   : > { %v549_v50 = vpop.xlane.xlu1 %548 }
 0x243   : > { %v550_v52 = vcvt.f32.s32 %v549_v50 }
 0x245   : > { %v553_v53 = vadd.s32 %v552_v51, %v550_v52 }
 0x247   : > { %vm554_vm5 = vcmp.eq.s32.totalorder %v1347_v5, %v553_v53  ;;  %vm555_vm6 = vcmp.eq.s32.totalorder %v1350_v6, %v553_v53 }
 0x248   : > { %854 = vmatmul.msk.f32.vlgmr.msra.gmra.mxu2 %vm554_vm5, %v1129_v54  ;;  %855 = vmatmul.msk.f32.vlgmr.msra.gmra.mxu3 %vm555_vm6, %v1129_v54 }
 0x2c8   : > { %635 = sbr.rel (%p856_p12) target bundleno = 720 (0x2d0), region = 98 }
 0x2cb   : > { %v609_v55 = vpop.f32.mrf.mxu2  ;;  %v629_v56 = vpop.f32.mrf.mxu3 }
 0x2cc   : > { %v630_v57 = vadd.f32 %v629_v56, %v609_v55 }
 0x2cd   : > { %vm636_vm7 = vcmask 7168  }
 0x2ce   : > { %638 = vst.msk [vmem:[#allocation2] sm:$0xff] %vm480_vm0, %v630_v57 }
 0x2cf   : > { %637 = vst.msk [vmem:[#allocation3] sm:$0xff] %vm636_vm7, %v1352_v7 }
 0x2d0 PF: > { %p857_p13 = scmp.le.s32.totalorder %s1110_s28, 0 }
 0x2d2   : > { %642 = sbr.rel (%p857_p13) target bundleno = 848 (0x350), region = 102 }
 0x2d7   : > { %v643_v58 = vld [vmem:[#allocation3] sm:$0xff]  ;;  %vm646_vm8 = vcmask 7168   ;;  %v1130_v59 = vmov 0   ;;  %v648_v62 = vld [vmem:[#allocation2] sm:$0xff] }
 0x2d8   : > { %980 = vset.pattern.permute.xlu0 %v1130_v59  ;;  %vm644_vm9 = vcmp.gt.f32.partialorder %v1352_v7, %v643_v58 }
 0x2d9   : > { %v649_v60 = vsel %vm644_vm9, 1, %v1130_v59  ;;  %v645_v61 = vsel %vm644_vm9, %v1352_v7, %v643_v58 }
 0x2da   : > { %651 = vperm.xlu0 %980, %v649_v60   ;;  %647 = vst.msk [vmem:[#allocation3] sm:$0xff] %vm646_vm8, %v645_v61 }
 0x34c   : > { %v652_v63 = vpop.permute.xlu0 %651 }
 0x34d   : > { %vm653_vm10 = vcmp.eq.s32.totalorder %v652_v63, 1 }
 0x34e   : > { %v654_v0 = vsel %vm653_vm10, %v630_v57, %v648_v62 }
 0x34f   : > { %655 = vst.msk [vmem:[#allocation2] sm:$0xff] %vm480_vm0, %v654_v0 }
 0x350 PF: > { %p858_p1 = scmp.ne.s32.totalorder %s1110_s28, 3 }
 0x352   : > { %659 = sbr.rel (%p858_p1) target bundleno = 857 (0x359), region = 106 }
 0x357   : > { %v660_v1 = vld [vmem:[#allocation2] sm:$0xff] }
 0x358   : > { %661 = vst.msk [vmem:[%s409_s15] sm:$0xff] %vm480_vm0, %v660_v1 }
 0x359 PF: > { %s860_s17 = sshll.u32 %s1114_s29, 3  ;;  %s1504_s26 = sld [smem:[#allocation19_spill]] }
 0x35a   : > { %s675_s20 = sshll.u32 %s409_s15, 4  ;;  %s663_s16 = scalar_lea.sflag [#allocation5], %s407_s3  ;;  %s676_s20 = int_to_ptr.vmem [resolvable:$true] %s675_s20 }
 0x35f   : > { %s1505_s9 = smov %s1504_s26  ;;  %s673_s10 = scalar_lea.hbm %s1504_s26, %s860_s17 }
 0x360   : > { %s677_s28 = sshll.u32 %s673_s10, 4  ;;  %s1016_s0 = scalar_lea.hbm %s1505_s9, 16  ;;  %s678_s28 = int_to_ptr.hbm [resolvable:$true] %s677_s28 }
 0x361   : > { %s1010_s6 = sshra.s32 %s678_s28, 4  ;;  %s1011_s6 = int_to_ptr.hbm [resolvable:$true] %s1010_s6 }
 0x362   : > { %s1012_s11 = scalar_lea.hbm %s1011_s6, 8  ;;  %p1017_p8 = scmp.lt.s32.totalorder %s1011_s6, %s1505_s9 }
 0x363   : > { %p1013_p4 = scmp.ne.s32.totalorder %s1011_s6, %s1012_s11  ;;  %p1018_p9 = scmp.lt.s32.totalorder %s1016_s0, %s1012_s11 }
 0x365   : > { %p1014_p5 = pnand %p1013_p4, %p1270_p0  ;;  %p1019_p10 = por %p1018_p9, %p1017_p8 }
 0x367   : > { %p1015_p6 = pneg %p1014_p5 }
 0x369   : > { %p1020_p3 = pnand %p1019_p10, %p1015_p6 }
 0x36b   : > { %1023 = shalt.err (!%p1020_p3)
}
 0x36c   : > { %868 = dma.vmem_to_hbm [thread:$0]  (%p1270_p0), %s676_s20, 128, %s678_s28, %s663_s16  }
 0x36d PF: > { %p880_p7 = scmp.ge.s32.totalorder %s1126_s8, 2  ;;  %s689_s3 = sand.u32 1, %s1082_s21  }
 0x36e   : > { %s690_s14 = scalar_lea.sflag [#allocation5], %s689_s3 }
 0x36f   : > { %p875_p11 = pnand %p880_p7, %p1275_p2 }
 0x371   : > { %p876_p12 = pneg %p875_p11 }
 0x373   : > { %1077 = dma.done.wait (%p876_p12), %s690_s14, 128  }
 0x374   : > { %1079 = vsyncadd (%p876_p12), %s690_s14, 4294967168  ;;  %s20_s8 = sadd.s32 1, %s1126_s8   ;;  %s1506_s15 = sld [smem:[#allocation15_spill]] }
 0x375   : > { %p17_p13 = scmp.ge.s32.totalorder %s20_s8, 10   ;;  %s1507_s13 = sld [smem:[#allocation16_spill]] }
 0x376   : > { %s1508_s10 = sld [smem:[#allocation14_spill]]  ;;  %s1511_s21 = smov %s1086_s22 }
 0x377   : > { %s1509_s20 = sld [smem:[#allocation12_spill]]  ;;  %s1512_s22 = smov %s1090_s23 }
 0x378   : > { %s1510_s16 = sld [smem:[#allocation13_spill]]  ;;  %s1514_s24 = smov %s1098_s25 }
 0x379   : > { %s1516_s26 = smov %s1106_s27  ;;  %s1518_s28 = smov %s1118_s30 }
 0x37a   : > { %s1513_s23 = smov %s1506_s15  ;;  %s1519_s29 = smov %s1122_s7 }
 0x37b   : > { %s1515_s25 = smov %s1507_s13  ;;  %19 = sbr.rel (!%p17_p13) target bundleno = 12 (0xc), region = 164 }
 0x37c   : > { %s1517_s27 = smov %s1508_s10 }
 0x37d   : > { %s1520_s30 = smov %s1509_s20 }
 0x37e   : > { %s1521_s7 = smov %s1510_s16 }
 0x380   :  { %696 = vsyncpa [#allocation5], 1 }
 0x381   :  { %698 = vsyncpa [#allocation5 + $0x1], 1 }
 0x382   :  { %699 = vsyncpa [#allocation6], 1 }
 0x383   :  { %701 = vsyncpa [#allocation6 + $0x1], 1 }

</bundles_post_ra>
